<compile_context>
chip_gen: v6e
topology: v6e:2x2x1
jax: 0.10.0
libtpu: 0.0.40
codegen_flags: <defaults>
</compile_context>

<pallas_src>
import functools
import math

import jax
import jax.numpy as jnp
from jax.experimental import pallas as pl
from jax.experimental.pallas import tpu as pltpu


def _round_up(x, m):
    return ((x + m - 1) // m) * m


def _diffs_kernel(test_ref, train_ref, out_ref, *, reps, n_groups, group_w):
    """One (test-tile, train-tile) block of pairwise differences.

    test_ref : (tm, d)      tile of test points
    train_ref: (1, tn*d)    tile of train points, flattened lane-dense
    out_ref  : (tm, tn*d)   out[r, j*d + k] = test[r, k] - train[j, k]

    The test tile is replicated only to `group_w` lanes (a few vregs) and the
    output block is written group-by-group with unmasked 128-aligned stores,
    so no output-block-sized VMEM temporary is materialized.
    """
    t = test_ref[...]                                      # (tm, d)
    t_rep = t if reps == 1 else jnp.tile(t, (1, reps))     # (tm, group_w)
    for g in range(n_groups):                              # static unroll
        lo = g * group_w                                   # static, 128-aligned
        out_ref[:, pl.ds(lo, group_w)] = (
            t_rep - train_ref[:, pl.ds(lo, group_w)]
        ).astype(out_ref.dtype)


class KernelPallas:
    """JAX/Pallas port of the PyTorch `Kernel` base class."""

    # If lcm(d, 128) would exceed this, pad each feature row to a multiple of
    # 128 lanes instead (bounded <2x column waste, avoids pathological tiles).
    _LCM_MAX = 4096

    def __init__(self, bw=None):
        self.bw = 0.05 if bw is None else bw

    def _diffs(self, test_Xs, train_Xs, *,
               target_block_bytes=4 * 1024 * 1024,   # safe for v7x (64 MiB VMEM);
                                                     # bump to ~8 MiB on v5e/v6e
               max_flat_width_elems=4096):
        """Pairwise diffs: (N_test, *F) x (N_train, *F) -> (N_test, N_train, *F)."""
        n_test = test_Xs.shape[0]
        n_train = train_Xs.shape[0]
        feat_shape = tuple(test_Xs.shape[1:])
        assert tuple(train_Xs.shape[1:]) == feat_shape, "feature dims must match"
        d = math.prod(feat_shape) if feat_shape else 1

        dtype = jnp.result_type(test_Xs.dtype, train_Xs.dtype)
        itemsize = jnp.dtype(dtype).itemsize
        sublane = max(8, 32 // itemsize)          # 8 (f32) / 16 (bf16) / 32 (int8)

        # ----- per-feature column padding (only for awkward, large d) ---------
        if math.lcm(d, 128) > self._LCM_MAX:
            d_eff = _round_up(d, 128)
        else:
            d_eff = d
        lcm_ld = math.lcm(d_eff, 128)

        # ----- group width L: ~512 lanes, multiple of lcm(d_eff, 128) ---------
        L = lcm_ld * max(1, 512 // lcm_ld)
        cap_flat = max(lcm_ld, (max_flat_width_elems // lcm_ld) * lcm_ld)
        cap_need = max(lcm_ld, _round_up(n_train * d_eff, lcm_ld))
        L = min(L, cap_flat, cap_need)
        reps = L // d_eff                          # train points replicated per group

        # ----- train-axis tile (tn): multiple of reps, 128-aligned flat width --
        tn = min(max(reps, (max_flat_width_elems // L) * reps),
                 _round_up(n_train, reps))
        flat_w = tn * d_eff                        # always a multiple of 128
        n_groups = flat_w // L

        n_train_pad = _round_up(n_train, tn)
        grid_j = n_train_pad // tn

        # ----- test-axis tile (tm): ~target_block_bytes of output per step ----
        tm = target_block_bytes // max(flat_w * itemsize, 1)
        tm = max(sublane, (tm // sublane) * sublane)
        tm = min(tm, 2048, _round_up(n_test, sublane))
        # v7x has 2 TensorCores: make sure a large single-block-wide grid still
        # has >= 2 parallel program instances.
        total_out_bytes = n_test * n_train_pad * d_eff * itemsize
        if grid_j == 1 and total_out_bytes > (8 << 20):
            tm = min(tm, max(sublane, _round_up((n_test + 1) // 2, sublane)))

        n_test_pad = _round_up(n_test, tm)
        grid = (n_test_pad // tm, grid_j)

        # ----- build padded device arrays (pads are zeros, sliced off below) --
        test2d = test_Xs.reshape(n_test, d).astype(dtype)
        train2d = train_Xs.reshape(n_train, d).astype(dtype)
        if d_eff != d:
            test2d = jnp.pad(test2d, ((0, 0), (0, d_eff - d)))
            train2d = jnp.pad(train2d, ((0, 0), (0, d_eff - d)))
        if n_test_pad != n_test:
            test2d = jnp.pad(test2d, ((0, n_test_pad - n_test), (0, 0)))
        if n_train_pad != n_train:
            train2d = jnp.pad(train2d, ((0, n_train_pad - n_train), (0, 0)))
        train_flat = train2d.reshape(1, n_train_pad * d_eff)   # free reshape

        # ----- explicit VMEM budget (double-buffered blocks), v7x headroom ----
        out_block_b = tm * flat_w * itemsize
        in_block_b = tm * d_eff * itemsize + flat_w * itemsize
        vmem_limit = int(min(max(2 * (out_block_b + in_block_b) + (8 << 20),
                                 32 << 20),
                             48 << 20))

        out_flat = pl.pallas_call(
            functools.partial(_diffs_kernel,
                              reps=reps, n_groups=n_groups, group_w=L),
            out_shape=jax.ShapeDtypeStruct((n_test_pad, n_train_pad * d_eff),
                                           dtype),
            grid_spec=pl.GridSpec(
                grid=grid,
                in_specs=[
                    # tile of test points, marches over grid axis 0
                    pl.BlockSpec((tm, d_eff), lambda i, j: (i, 0)),
                    # tile of (flattened) train points, marches over grid axis 1
                    pl.BlockSpec((1, flat_w), lambda i, j: (0, j)),
                ],
                out_specs=pl.BlockSpec((tm, flat_w), lambda i, j: (i, j)),
            ),
            compiler_params=pltpu.CompilerParams(
                dimension_semantics=("parallel", "parallel"),
                vmem_limit_bytes=vmem_limit,
            ),
        )(test2d, train_flat)

        out = out_flat[:n_test].reshape(n_test, n_train_pad, d_eff)
        out = out[:, :n_train, :d]
        return out.reshape((n_test, n_train) + feat_shape)

    def forward(self, test_Xs, train_Xs):
        """Abstract in the reference module (interface only)."""
        # TODO(synk): forward has no implementation in the base class.
        return None

    def sample(self, train_Xs):
        """Abstract in the reference module (interface only)."""
        return None


def _diffs_reference(test_Xs, train_Xs):
    return test_Xs[:, None] - train_Xs[None, :]


if __name__ == "__main__":
    key = jax.random.PRNGKey(0)
    k1, k2, k3, k4 = jax.random.split(key, 4)

    kern = KernelPallas()

    # Case 1: small aligned shapes.
    n_test, n_train, d = 16, 16, 32
    test_Xs = jax.random.normal(k1, (n_test, d), dtype=jnp.float32)
    train_Xs = jax.random.normal(k2, (n_train, d), dtype=jnp.float32)
    diffs = jax.block_until_ready(kern._diffs(test_Xs, train_Xs))
    ref = _diffs_reference(test_Xs, train_Xs)
    assert diffs.shape == (n_test, n_train, d)
    assert jnp.allclose(diffs, ref, atol=1e-6, rtol=1e-6)

    # Case 2: non-divisible N_test (exercises row padding) plus a forced small
    # flat-width limit (exercises the 2-D (test, train) grid and the grouped,
    # 128-lane-aligned store path).
    n_test2, n_train2, d2 = 10, 16, 32
    test2 = jax.random.normal(k3, (n_test2, d2), dtype=jnp.float32)
    train2 = jax.random.normal(k4, (n_train2, d2), dtype=jnp.float32)
    diffs2 = jax.block_until_ready(
        kern._diffs(test2, train2, max_flat_width_elems=128))
    ref2 = _diffs_reference(test2, train2)
    assert diffs2.shape == (n_test2, n_train2, d2)
    assert jnp.allclose(diffs2, ref2, atol=1e-6, rtol=1e-6)

    print("KERNEL_OK")
</pallas_src>

<mosaic_0001>
module attributes {stable_mosaic.version = 11 : i64} {
  func.func @_diffs_kernel(%arg0: i32, %arg1: i32, %arg2: memref<16x32xf32, #tpu.memory_space<vmem>>, %arg3: memref<1x512xf32, #tpu.memory_space<vmem>>, %arg4: memref<16x512xf32, #tpu.memory_space<vmem>>) attributes {dimension_semantics = [#tpu.dimension_semantics<parallel>, #tpu.dimension_semantics<parallel>], iteration_bounds = array<i64: 1, 1>, scalar_prefetch = 0 : i64, scratch_operands = 0 : i64, tpu.core_type = #tpu.core_type<tc>, window_params = [{transform_indices = @transform_0, window_bounds = array<i64: 16, 32>}, {transform_indices = @transform_1, window_bounds = array<i64: 1, 512>}, {transform_indices = @transform_2, window_bounds = array<i64: 16, 512>}]} {
    %c0 = arith.constant 0 : index
    %c0_0 = arith.constant 0 : index
    %0 = vector.load %arg2[%c0, %c0_0] : memref<16x32xf32, #tpu.memory_space<vmem>>, vector<16x32xf32>
    %1 = tpu.concatenate %0, %0, %0, %0, %0, %0, %0, %0, %0, %0, %0, %0, %0, %0, %0, %0 in 1 : vector<16x32xf32>, vector<16x32xf32>, vector<16x32xf32>, vector<16x32xf32>, vector<16x32xf32>, vector<16x32xf32>, vector<16x32xf32>, vector<16x32xf32>, vector<16x32xf32>, vector<16x32xf32>, vector<16x32xf32>, vector<16x32xf32>, vector<16x32xf32>, vector<16x32xf32>, vector<16x32xf32>, vector<16x32xf32> -> vector<16x512xf32>
    %c0_1 = arith.constant 0 : index
    %c0_2 = arith.constant 0 : index
    %2 = vector.load %arg3[%c0_1, %c0_2] : memref<1x512xf32, #tpu.memory_space<vmem>>, vector<1x512xf32>
    %3 = vector.broadcast %2 : vector<1x512xf32> to vector<16x512xf32>
    %4 = arith.subf %1, %3 : vector<16x512xf32>
    %c0_3 = arith.constant 0 : index
    %c0_4 = arith.constant 0 : index
    %5 = vector.load %arg4[%c0_3, %c0_4] : memref<16x512xf32, #tpu.memory_space<vmem>>, vector<16x512xf32>
    tpu.vector_store %arg4[%c0_3, %c0_4], %4 {strides = array<i32>} : memref<16x512xf32, #tpu.memory_space<vmem>>, vector<16x512xf32>,
    return
  }
  func.func @transform_0(%arg0: i32, %arg1: i32) -> (i32, i32) {
    %c0_i32 = arith.constant 0 : i32
    %c0_i32_0 = arith.constant 0 : i32
    return %arg0, %c0_i32 : i32, i32
  }
  func.func @transform_1(%arg0: i32, %arg1: i32) -> (i32, i32) {
    %c0_i32 = arith.constant 0 : i32
    %c0_i32_0 = arith.constant 0 : i32
    return %c0_i32, %arg1 : i32, i32
  }
  func.func @transform_2(%arg0: i32, %arg1: i32) -> (i32, i32) {
    %c0_i32 = arith.constant 0 : i32
    return %arg0, %arg1 : i32, i32
  }
}

</mosaic_0001>

<bundles_post_ra>
// kernel: tpu_custom_call.1
= control target key start
LH: loop header
LB: loop body
LE: loop exit
PB: predicated region body
PF: predicated region fallthrough
CT: control target
= control target key end

     0   :  { %7 = vsyncpa [#allocation3], 0  ;;  %s236_s0 = inlined_call_operand.hbm [shape: f32[16,32], index: 0, kind: input, shape index: {}]   ;;  %s237_s1 = inlined_call_operand.hbm [shape: f32[1,512], index: 1, kind: input, shape index: {}]   ;;  %s238_s2 = inlined_call_operand.hbm [shape: f32[16,512], index: 2, kind: output, shape index: {}]  }
   0x1   :  { %8 = vsyncpa [#allocation6], 0 }
   0x2   :  { %9 = vsyncpa [#allocation4], 0  ;;  %s200_s9 = smov [#allocation2]  }
   0x3   :  { %s15_s10 = sshll.u32 %s200_s9, 4  ;;  %s16_s10 = int_to_ptr.vmem [resolvable:$true] %s15_s10 }
   0x4   :  { %s142_s11 = scalar_lea.vmem %s16_s10, 256  ;;  %p147_p1 = scmp.lt.s32.totalorder %s16_s10, %s16_s10 }
   0x5   :  { %p143_p0 = scmp.ne.s32.totalorder %s16_s10, %s142_s11  ;;  %p148_p2 = scmp.lt.s32.totalorder %s142_s11, %s142_s11 }
   0x7   :  { %p149_p3 = por %p148_p2, %p147_p1 }
   0x9   :  { %p150_p4 = pnand %p149_p3, %p143_p0 }
   0xb   :  { %153 = shalt.err (!%p150_p4)
}
   0xc   :  { %s201_s12 = smov 128   ;;  %s202_s13 = smov 8  }
   0xd   :  { %21 = dma.hbm_to_vmem [thread:$0]  %s236_s0, 256, %s16_s10, [#allocation3], %s201_s12, %s201_s12, %s202_s13  }
   0xe   :  { %s203_s16 = smov [#allocation5]  }
   0xf   :  { %s28_s17 = sshll.u32 %s203_s16, 4  ;;  %s29_s17 = int_to_ptr.vmem [resolvable:$true] %s28_s17 }
  0x10   :  { %s162_s18 = scalar_lea.vmem %s29_s17, 64  ;;  %p167_p6 = scmp.lt.s32.totalorder %s29_s17, %s29_s17 }
  0x11   :  { %p163_p5 = scmp.ne.s32.totalorder %s29_s17, %s162_s18  ;;  %p168_p7 = scmp.lt.s32.totalorder %s162_s18, %s162_s18 }
  0x13   :  { %p169_p8 = por %p168_p7, %p167_p6 }
  0x15   :  { %p170_p9 = pnand %p169_p8, %p163_p5 }
  0x17   :  { %173 = shalt.err (!%p170_p9)
}
  0x18   :  { %31 = dma.hbm_to_vmem [thread:$0]  %s237_s1, 64, %s29_s17, [#allocation6]  }
  0x19   :  { %194 = dma.done.wait [#allocation3], 256  }
  0x1a   :  { %195 = vsyncadd [#allocation3], 4294967040 }
  0x1b   :  { %196 = dma.done.wait [#allocation6], 64  }
  0x1c   :  { %197 = vsyncadd [#allocation6], 4294967232  ;;  %v38_v0 = vld [vmem:[#allocation2] sm:$0xff]  ;;  %s204_s0 = smov 64   ;;  %s205_s21 = smov 32   ;;  %v39_v1 = vld [vmem:[#allocation2 + $0x8] sm:$0xff]  ;;  %v71_v2 = vlaneseq }
  0x1d   :  { %48 = vrot.lane.b32.xlu1 %v38_v0, %s204_s0  ;;  %42 = vrot.lane.b32.xlu0 %v38_v0, %s205_s21  ;;  %s206_s22 = smov 96   ;;  %vm60_vm0 = vcmask 261120   ;;  %v69_v10 = vld [vmem:[#allocation5] sm:$0xf]  ;;  %vm63_vm1 = vcmask 523264   ;;  %vm66_vm2 = vcmask 785408  }
  0x1e   :  { %v72_v3 = vshrl.u32 %v71_v2, 7  ;;  %s207_s1 = smov [#allocation7]  }
  0x1f   :  { %s112_s23 = sshll.u32 %s207_s1, 4  ;;  %s113_s23 = int_to_ptr.vmem [resolvable:$true] %s112_s23 }
  0x20   :  { %v73_v6 = vsub.s32 0, %v72_v3  ;;  %v77_v7 = vsub.s32 1, %v72_v3  ;;  %v81_v8 = vsub.s32 2, %v72_v3  ;;  %v85_v9 = vsub.s32 3, %v72_v3  ;;  %s174_s24 = scalar_lea.vmem %s113_s23, 1024  ;;  %p179_p11 = scmp.lt.s32.totalorder %s113_s23, %s113_s23 }
  0x21   :  { %50 = vrot.lane.b32.xlu1 %v39_v1, %s204_s0  ;;  %44 = vrot.lane.b32.xlu0 %v39_v1, %s205_s21  ;;  %p175_p10 = scmp.ne.s32.totalorder %s113_s23, %s174_s24  ;;  %p180_p12 = scmp.lt.s32.totalorder %s174_s24, %s174_s24 }
  0x22   :  { %v74_v15 = vrot.slane %v69_v10, %v73_v6  ;;  %v78_v16 = vrot.slane %v69_v10, %v77_v7  ;;  %v82_v17 = vrot.slane %v69_v10, %v81_v8  ;;  %v86_v18 = vrot.slane %v69_v10, %v85_v9 }
  0x23   :  { %p181_p13 = por %p180_p12, %p179_p11 }
  0x25   :  { %56 = vrot.lane.b32.xlu1 %v39_v1, %s206_s22  ;;  %54 = vrot.lane.b32.xlu0 %v38_v0, %s206_s22  ;;  %p182_p0 = pnand %p181_p13, %p175_p10 }
  0x8f   :  { %v49_v4 = vpop.permute.xlu1 %48  ;;  %v43_v5 = vpop.permute.xlu0 %42 }
  0x90   :  { %v61_v13 = vsel %vm60_vm0, %v38_v0, %v43_v5 }
  0x91   :  { %v64_v21 = vsel %vm63_vm1, %v61_v13, %v49_v4 }
  0x93   :  { %v51_v11 = vpop.permute.xlu1 %50  ;;  %v45_v12 = vpop.permute.xlu0 %44 }
  0x94   :  { %v62_v14 = vsel %vm60_vm0, %v39_v1, %v45_v12 }
  0x95   :  { %v65_v20 = vsel %vm63_vm1, %v62_v14, %v51_v11 }
  0x97   :  { %v57_v19 = vpop.permute.xlu1 %56  ;;  %v55_v22 = vpop.permute.xlu0 %54 }
  0x98   :  { %v68_v23 = vsel %vm66_vm2, %v65_v20, %v57_v19  ;;  %v67_v24 = vsel %vm66_vm2, %v64_v21, %v55_v22 }
  0x99   :  { %v95_v25 = vsub.f32 %v68_v23, %v74_v15  ;;  %v96_v26 = vsub.f32 %v68_v23, %v78_v16  ;;  %v97_v27 = vsub.f32 %v68_v23, %v82_v17  ;;  %v98_v28 = vsub.f32 %v68_v23, %v86_v18 }
  0x9a   :  { %v91_v29 = vsub.f32 %v67_v24, %v74_v15  ;;  %v92_v30 = vsub.f32 %v67_v24, %v78_v16  ;;  %v93_v31 = vsub.f32 %v67_v24, %v82_v17  ;;  %v94_v32 = vsub.f32 %v67_v24, %v86_v18 }
  0x9b   :  { %103 = vst [vmem:[#allocation7 + $0x20] sm:$0xff] %v95_v25  ;;  %104 = vst [vmem:[#allocation7 + $0x28] sm:$0xff] %v96_v26 }
  0x9c   :  { %105 = vst [vmem:[#allocation7 + $0x30] sm:$0xff] %v97_v27  ;;  %106 = vst [vmem:[#allocation7 + $0x38] sm:$0xff] %v98_v28 }
  0x9d   :  { %99 = vst [vmem:[#allocation7] sm:$0xff] %v91_v29  ;;  %100 = vst [vmem:[#allocation7 + $0x8] sm:$0xff] %v92_v30 }
  0x9e   :  { %101 = vst [vmem:[#allocation7 + $0x10] sm:$0xff] %v93_v31  ;;  %102 = vst [vmem:[#allocation7 + $0x18] sm:$0xff] %v94_v32 }
  0x9f   :  { %185 = shalt.err (!%p182_p0)
}
  0xa0   :  { %s208_s25 = smov 512  }
  0xa1   :  { %118 = dma.vmem_to_hbm [thread:$0]  %s113_s23, 1024, %s238_s2, [#allocation4], %s208_s25, %s208_s25, %s205_s21  }
  0xa2   :  { %198 = dma.done.wait [#allocation4], 1024  }
  0xa3   :  { %199 = vsyncadd [#allocation4], 4294966272 }
  0xa4   :  { %122 = vsyncpa [#allocation3], 1 }
  0xa5   :  { %123 = vsyncpa [#allocation6], 1 }
  0xa6   :  { %124 = vsyncpa [#allocation4], 1 }

</bundles_post_ra>
